<compile_context>
chip_gen: v6e
topology: v6e:2x2x1
jax: 0.10.0
libtpu: 0.0.40
codegen_flags: <defaults>
</compile_context>

<pallas_src>
import jax
import jax.numpy as jnp
from jax import lax
from jax.experimental import pallas as pl
from jax.experimental.pallas import tpu as pltpu


def _round_up(x, m):
    return ((x + m - 1) // m) * m


def _vmem_capacity_bytes():
    try:
        return int(pltpu.get_tpu_info().vmem_capacity_bytes)
    except Exception:
        return 64 << 20  # conservative fallback (v7x per-TC VMEM)


def _pick_t_chunk(T, b_pad, h_pad, pre_bytes, budget_bytes):
    """Largest chunk whose double-buffered streamed-pre fits the VMEM budget."""
    per_t = b_pad * h_pad * pre_bytes * 2          # x2: double-buffered pipeline
    max_t = max(2, int(budget_bytes // per_t))
    if T <= max_t:
        return T                                   # single chunk: no tail, no grid overhead
    t = max_t
    # Prefer a divisor of T (keeps tail masking off the common path) that keeps
    # the bf16 sublane tiling legal (rows % 16 == 0).
    for cand in range(t, max(2, t // 2) - 1, -1):
        if T % cand == 0 and (cand * b_pad) % 16 == 0:
            return cand
    t -= t % 2                                     # even chunk => rows % 16 == 0
    return max(2, t)


def _make_rnn_kernel(T, t_chunk, b_pad, n_chunks, need_mask, unroll):
    """Kernel body, specialized on static shapes."""

    def kernel(pre_ref, whh_ref, wd_ref, bd_ref, out_ref, h_ref):
        # pre_ref: (t_chunk, b_pad, H_pad)  streamed, pre_dtype (bf16/f32)
        # whh_ref: (H_pad, H_pad) f32       resident
        # wd_ref : (H_pad, C_pad) f32       resident
        # bd_ref : (1, C_pad) f32           resident
        # out_ref: (b_pad, C_pad) f32       written only at the last chunk
        # h_ref  : (b_pad, H_pad) f32       persistent hidden-state scratch
        c = pl.program_id(0)

        # First chunk: zero-init hidden state (PyTorch passes state=None).
        @pl.when(c == 0)
        def _():
            h_ref[...] = jnp.zeros_like(h_ref)

        whh = whh_ref[...]                                   # (H_pad, H_pad) f32

        def chunk_loop(h0, masked):
            def body(t, h):
                pre_t = pre_ref[t].astype(jnp.float32)       # (b_pad, H_pad)
                h_new = jnp.tanh(
                    pre_t + jnp.dot(h, whh, preferred_element_type=jnp.float32))
                if masked:
                    # Zero-padded tail time steps must not advance the state.
                    valid = (c * t_chunk + t) < T
                    h_new = jnp.where(valid, h_new, h)
                return h_new
            return lax.fori_loop(0, t_chunk, body, h0, unroll=unroll)

        if need_mask:
            @pl.when(c < n_chunks - 1)
            def _():
                h_ref[...] = chunk_loop(h_ref[...], False)

            @pl.when(c == n_chunks - 1)
            def _():
                h_ref[...] = chunk_loop(h_ref[...], True)
        else:
            h_ref[...] = chunk_loop(h_ref[...], False)

        # Last chunk: final dense layer, lane-dense (C padded to 128).
        @pl.when(c == n_chunks - 1)
        def _():
            h = h_ref[...]
            out_ref[...] = (jnp.dot(h, wd_ref[...],
                                    preferred_element_type=jnp.float32)
                            + bd_ref[...])

    return kernel


def rnn_model_forward(inputs, params, *, t_chunk=None, pre_dtype=jnp.bfloat16):
    """inputs: (B, I, T) float32 (PyTorch layout). Returns (B, num_classes) f32."""
    inputs = inputs.astype(jnp.float32)
    B, I, T = inputs.shape
    H = params["whh_t"].shape[0]
    C = params["wd_t"].shape[1]

    # ---- TPU-friendly padding (lane-dense hidden + output) ------------------
    B_pad = _round_up(B, 8)                 # f32 sublane multiple
    H_pad = _round_up(H, 128)               # lane-dense hidden state everywhere
    C_pad = _round_up(C, 128)               # lane-dense output store

    wih = jnp.pad(params["wih_t"], ((0, 0), (0, H_pad - H)))                # (I, H_pad)
    b_rnn = jnp.pad((params["bih"] + params["bhh"]).reshape(1, -1),
                    ((0, 0), (0, H_pad - H)))                               # (1, H_pad)
    whh = jnp.pad(params["whh_t"],
                  ((0, H_pad - H), (0, H_pad - H))).astype(jnp.float32)     # (H_pad, H_pad)
    wd = jnp.pad(params["wd_t"],
                 ((0, H_pad - H), (0, C_pad - C))).astype(jnp.float32)      # (H_pad, C_pad)
    bd = jnp.pad(params["bd"].reshape(1, -1),
                 ((0, 0), (0, C_pad - C))).astype(jnp.float32)              # (1, C_pad)

    # Hoisted input projection in the wrapper (I is tiny, so an in-kernel
    # projection would stream lane-sparse blocks).  The time-major permute is
    # folded into this single einsum; fused RNN bias added here too.
    pre = jnp.einsum("bit,ih->tbh", inputs, wih,
                     precision=lax.Precision.HIGHEST) + b_rnn               # (T, B, H_pad) f32

    # ---- VMEM-budgeted chunking over time ------------------------------------
    pre_bytes = jnp.dtype(pre_dtype).itemsize
    vmem_cap = _vmem_capacity_bytes()
    vmem_limit = int(min(int(vmem_cap * 0.75), 100 << 20))
    resident = ((H_pad * H_pad + H_pad * C_pad) * 4        # whh + wd
                + B_pad * (H_pad + C_pad) * 4 + C_pad * 4)  # h scratch + out + bd
    stream_budget = max(1 << 20, int(vmem_limit * 0.6) - resident)
    if t_chunk is None:
        t_chunk = _pick_t_chunk(T, B_pad, H_pad, pre_bytes, stream_budget)
    t_chunk = max(1, min(int(t_chunk), T))
    n_chunks = (T + t_chunk - 1) // t_chunk
    T_pad = n_chunks * t_chunk
    need_mask = (T_pad != T)

    pre = jnp.pad(pre, ((0, T_pad - T), (0, B_pad - B), (0, 0))).astype(pre_dtype)
    unroll = max(1, min(8, t_chunk))

    kernel = _make_rnn_kernel(T, t_chunk, B_pad, n_chunks, need_mask, unroll)

    out = pl.pallas_call(
        kernel,
        out_shape=jax.ShapeDtypeStruct((B_pad, C_pad), jnp.float32),
        grid_spec=pltpu.PrefetchScalarGridSpec(
            num_scalar_prefetch=0,
            grid=(n_chunks,),
            in_specs=[
                pl.BlockSpec((t_chunk, B_pad, H_pad), lambda c: (c, 0, 0)),  # streamed pre
                pl.BlockSpec((H_pad, H_pad), lambda c: (0, 0)),              # W_hh^T (resident)
                pl.BlockSpec((H_pad, C_pad), lambda c: (0, 0)),              # dense W^T (padded)
                pl.BlockSpec((1, C_pad), lambda c: (0, 0)),                  # dense bias (padded)
            ],
            out_specs=pl.BlockSpec((B_pad, C_pad), lambda c: (0, 0)),
            scratch_shapes=[pltpu.VMEM((B_pad, H_pad), jnp.float32)],        # hidden state
        ),
        compiler_params=pltpu.CompilerParams(
            dimension_semantics=("arbitrary",),   # recurrence is serial over chunks
            vmem_limit_bytes=vmem_limit),
    )(pre, whh, wd, bd)

    return out[:B, :C]


def init_params(key, input_size, hidden_size, num_classes):
    """Uniform(-1/sqrt(H), 1/sqrt(H)) init, like PyTorch. Weights stored transposed."""
    k = 1.0 / jnp.sqrt(jnp.float32(hidden_size))
    ks = jax.random.split(key, 6)
    u = lambda kk, shape: jax.random.uniform(kk, shape, jnp.float32, -k, k)
    return {
        "wih_t": u(ks[0], (input_size, hidden_size)),    # W_ih^T
        "whh_t": u(ks[1], (hidden_size, hidden_size)),   # W_hh^T
        "bih":   u(ks[2], (1, hidden_size)),
        "bhh":   u(ks[3], (1, hidden_size)),
        "wd_t":  u(ks[4], (hidden_size, num_classes)),   # dense.weight^T
        "bd":    u(ks[5], (1, num_classes)),
    }


def reference_forward(inputs, params):
    """Pure-JAX f32 reference of the same semantics."""
    x = jnp.transpose(inputs, (2, 0, 1)).astype(jnp.float32)   # (T, B, I)
    T, B, _ = x.shape
    H = params["whh_t"].shape[0]
    h = jnp.zeros((B, H), jnp.float32)
    hi = lax.Precision.HIGHEST
    for t in range(T):
        h = jnp.tanh(jnp.dot(x[t], params["wih_t"], precision=hi) + params["bih"]
                     + jnp.dot(h, params["whh_t"], precision=hi) + params["bhh"])
    return jnp.dot(h, params["wd_t"], precision=hi) + params["bd"]


if __name__ == "__main__":
    batch, input_size, seq_len = 2, 4, 8
    hidden_size, num_classes = 32, 3

    key = jax.random.PRNGKey(0)
    k_in, k_par = jax.random.split(key)
    inputs = jax.random.normal(k_in, (batch, input_size, seq_len), jnp.float32)
    params = init_params(k_par, input_size, hidden_size, num_classes)

    ref = reference_forward(inputs, params)

    # Exact path (f32 streamed pre, f32 recurrence): tight check.
    out_f32 = jax.block_until_ready(
        rnn_model_forward(inputs, params, pre_dtype=jnp.float32))
    assert out_f32.shape == (batch, num_classes)
    assert jnp.allclose(out_f32, ref, atol=1e-4, rtol=1e-4)

    # Default fast path (bf16 streamed pre, f32 recurrence): looser tolerance.
    out = jax.block_until_ready(rnn_model_forward(inputs, params))
    assert out.shape == (batch, num_classes)
    assert jnp.allclose(out, ref, atol=3e-2, rtol=3e-2)

    # Multi-chunk streamed path with tail masking (exercises the grid carry).
    out_chunked = jax.block_until_ready(
        rnn_model_forward(inputs, params, t_chunk=3, pre_dtype=jnp.float32))
    assert jnp.allclose(out_chunked, ref, atol=1e-4, rtol=1e-4)

    print("KERNEL_OK")
</pallas_src>

<mosaic_0001>
module attributes {stable_mosaic.version = 11 : i64} {
  func.func @kernel(%arg0: i32, %arg1: memref<8x8x128xf32, #tpu.memory_space<vmem>>, %arg2: memref<128x128xf32, #tpu.memory_space<vmem>>, %arg3: memref<128x128xf32, #tpu.memory_space<vmem>>, %arg4: memref<1x128xf32, #tpu.memory_space<vmem>>, %arg5: memref<8x128xf32, #tpu.memory_space<vmem>>, %arg6: memref<8x128xf32, #tpu.memory_space<vmem>>) attributes {dimension_semantics = [#tpu.dimension_semantics<arbitrary>], iteration_bounds = array<i64: 1>, scalar_prefetch = 0 : i64, scratch_operands = 1 : i64, tpu.core_type = #tpu.core_type<tc>, window_params = [{transform_indices = @transform_0, window_bounds = array<i64: 8, 8, 128>}, {pipeline_mode = #tpu.pipeline_mode<synchronous>, transform_indices = @transform_1, window_bounds = array<i64: 128, 128>}, {pipeline_mode = #tpu.pipeline_mode<synchronous>, transform_indices = @transform_2, window_bounds = array<i64: 128, 128>}, {pipeline_mode = #tpu.pipeline_mode<synchronous>, transform_indices = @transform_3, window_bounds = array<i64: 1, 128>}, {pipeline_mode = #tpu.pipeline_mode<synchronous>, transform_indices = @transform_4, window_bounds = array<i64: 8, 128>}]} {
    %c0_i32 = arith.constant 0 : i32
    %0 = arith.cmpi eq, %arg0, %c0_i32 : i32
    %1 = arith.extui %0 : i1 to i32
    %c0_i32_0 = arith.constant 0 : i32
    %2 = arith.cmpi ne, %1, %c0_i32_0 : i32
    scf.if %2 {
      %cst_32 = arith.constant 0.000000e+00 : f32
      %57 = vector.broadcast %cst_32 : f32 to vector<8x128xf32>
      %c0_33 = arith.constant 0 : index
      %c0_34 = arith.constant 0 : index
      %58 = vector.load %arg6[%c0_33, %c0_34] : memref<8x128xf32, #tpu.memory_space<vmem>>, vector<8x128xf32>
      tpu.vector_store %arg6[%c0_33, %c0_34], %57 {strides = array<i32>} : memref<8x128xf32, #tpu.memory_space<vmem>>, vector<8x128xf32>,
    } else {
    }
    %c0 = arith.constant 0 : index
    %c0_1 = arith.constant 0 : index
    %3 = vector.load %arg2[%c0, %c0_1] : memref<128x128xf32, #tpu.memory_space<vmem>>, vector<128x128xf32>
    %c0_2 = arith.constant 0 : index
    %c0_3 = arith.constant 0 : index
    %4 = vector.load %arg6[%c0_2, %c0_3] : memref<8x128xf32, #tpu.memory_space<vmem>>, vector<8x128xf32>
    %c0_i32_4 = arith.constant 0 : i32
    %5 = arith.index_cast %c0_i32_4 : i32 to index
    %c0_5 = arith.constant 0 : index
    %c0_6 = arith.constant 0 : index
    %6 = vector.load %arg1[%5, %c0_5, %c0_6] : memref<8x8x128xf32, #tpu.memory_space<vmem>>, vector<1x8x128xf32>
    %7 = vector.shape_cast %6 : vector<1x8x128xf32> to vector<8x128xf32>
    %cst = arith.constant dense<0.000000e+00> : vector<8x128xf32>
    %8 = tpu.matmul %4, %3, %cst {dimension_numbers = #tpu.dot_dimension_numbers<[1], [0], [0], [1], [0, 0, 1, 1], [], []>} : vector<8x128xf32>, vector<128x128xf32>, vector<8x128xf32> -> vector<8x128xf32>
    %9 = arith.addf %7, %8 : vector<8x128xf32>
    %10 = math.tanh %9 : vector<8x128xf32>
    %c1_i32 = arith.constant 1 : i32
    %11 = arith.index_cast %c1_i32 : i32 to index
    %c0_7 = arith.constant 0 : index
    %c0_8 = arith.constant 0 : index
    %12 = vector.load %arg1[%11, %c0_7, %c0_8] : memref<8x8x128xf32, #tpu.memory_space<vmem>>, vector<1x8x128xf32>
    %13 = vector.shape_cast %12 : vector<1x8x128xf32> to vector<8x128xf32>
    %cst_9 = arith.constant dense<0.000000e+00> : vector<8x128xf32>
    %14 = tpu.matmul %10, %3, %cst_9 {dimension_numbers = #tpu.dot_dimension_numbers<[1], [0], [0], [1], [0, 0, 1, 1], [], []>} : vector<8x128xf32>, vector<128x128xf32>, vector<8x128xf32> -> vector<8x128xf32>
    %15 = arith.addf %13, %14 : vector<8x128xf32>
    %16 = math.tanh %15 : vector<8x128xf32>
    %c2_i32 = arith.constant 2 : i32
    %17 = arith.index_cast %c2_i32 : i32 to index
    %c0_10 = arith.constant 0 : index
    %c0_11 = arith.constant 0 : index
    %18 = vector.load %arg1[%17, %c0_10, %c0_11] : memref<8x8x128xf32, #tpu.memory_space<vmem>>, vector<1x8x128xf32>
    %19 = vector.shape_cast %18 : vector<1x8x128xf32> to vector<8x128xf32>
    %cst_12 = arith.constant dense<0.000000e+00> : vector<8x128xf32>
    %20 = tpu.matmul %16, %3, %cst_12 {dimension_numbers = #tpu.dot_dimension_numbers<[1], [0], [0], [1], [0, 0, 1, 1], [], []>} : vector<8x128xf32>, vector<128x128xf32>, vector<8x128xf32> -> vector<8x128xf32>
    %21 = arith.addf %19, %20 : vector<8x128xf32>
    %22 = math.tanh %21 : vector<8x128xf32>
    %c3_i32 = arith.constant 3 : i32
    %23 = arith.index_cast %c3_i32 : i32 to index
    %c0_13 = arith.constant 0 : index
    %c0_14 = arith.constant 0 : index
    %24 = vector.load %arg1[%23, %c0_13, %c0_14] : memref<8x8x128xf32, #tpu.memory_space<vmem>>, vector<1x8x128xf32>
    %25 = vector.shape_cast %24 : vector<1x8x128xf32> to vector<8x128xf32>
    %cst_15 = arith.constant dense<0.000000e+00> : vector<8x128xf32>
    %26 = tpu.matmul %22, %3, %cst_15 {dimension_numbers = #tpu.dot_dimension_numbers<[1], [0], [0], [1], [0, 0, 1, 1], [], []>} : vector<8x128xf32>, vector<128x128xf32>, vector<8x128xf32> -> vector<8x128xf32>
    %27 = arith.addf %25, %26 : vector<8x128xf32>
    %28 = math.tanh %27 : vector<8x128xf32>
    %c4_i32 = arith.constant 4 : i32
    %29 = arith.index_cast %c4_i32 : i32 to index
    %c0_16 = arith.constant 0 : index
    %c0_17 = arith.constant 0 : index
    %30 = vector.load %arg1[%29, %c0_16, %c0_17] : memref<8x8x128xf32, #tpu.memory_space<vmem>>, vector<1x8x128xf32>
    %31 = vector.shape_cast %30 : vector<1x8x128xf32> to vector<8x128xf32>
    %cst_18 = arith.constant dense<0.000000e+00> : vector<8x128xf32>
    %32 = tpu.matmul %28, %3, %cst_18 {dimension_numbers = #tpu.dot_dimension_numbers<[1], [0], [0], [1], [0, 0, 1, 1], [], []>} : vector<8x128xf32>, vector<128x128xf32>, vector<8x128xf32> -> vector<8x128xf32>
    %33 = arith.addf %31, %32 : vector<8x128xf32>
    %34 = math.tanh %33 : vector<8x128xf32>
    %c5_i32 = arith.constant 5 : i32
    %35 = arith.index_cast %c5_i32 : i32 to index
    %c0_19 = arith.constant 0 : index
    %c0_20 = arith.constant 0 : index
    %36 = vector.load %arg1[%35, %c0_19, %c0_20] : memref<8x8x128xf32, #tpu.memory_space<vmem>>, vector<1x8x128xf32>
    %37 = vector.shape_cast %36 : vector<1x8x128xf32> to vector<8x128xf32>
    %cst_21 = arith.constant dense<0.000000e+00> : vector<8x128xf32>
    %38 = tpu.matmul %34, %3, %cst_21 {dimension_numbers = #tpu.dot_dimension_numbers<[1], [0], [0], [1], [0, 0, 1, 1], [], []>} : vector<8x128xf32>, vector<128x128xf32>, vector<8x128xf32> -> vector<8x128xf32>
    %39 = arith.addf %37, %38 : vector<8x128xf32>
    %40 = math.tanh %39 : vector<8x128xf32>
    %c6_i32 = arith.constant 6 : i32
    %41 = arith.index_cast %c6_i32 : i32 to index
    %c0_22 = arith.constant 0 : index
    %c0_23 = arith.constant 0 : index
    %42 = vector.load %arg1[%41, %c0_22, %c0_23] : memref<8x8x128xf32, #tpu.memory_space<vmem>>, vector<1x8x128xf32>
    %43 = vector.shape_cast %42 : vector<1x8x128xf32> to vector<8x128xf32>
    %cst_24 = arith.constant dense<0.000000e+00> : vector<8x128xf32>
    %44 = tpu.matmul %40, %3, %cst_24 {dimension_numbers = #tpu.dot_dimension_numbers<[1], [0], [0], [1], [0, 0, 1, 1], [], []>} : vector<8x128xf32>, vector<128x128xf32>, vector<8x128xf32> -> vector<8x128xf32>
    %45 = arith.addf %43, %44 : vector<8x128xf32>
    %46 = math.tanh %45 : vector<8x128xf32>
    %c7_i32 = arith.constant 7 : i32
    %47 = arith.index_cast %c7_i32 : i32 to index
    %c0_25 = arith.constant 0 : index
    %c0_26 = arith.constant 0 : index
    %48 = vector.load %arg1[%47, %c0_25, %c0_26] : memref<8x8x128xf32, #tpu.memory_space<vmem>>, vector<1x8x128xf32>
    %49 = vector.shape_cast %48 : vector<1x8x128xf32> to vector<8x128xf32>
    %cst_27 = arith.constant dense<0.000000e+00> : vector<8x128xf32>
    %50 = tpu.matmul %46, %3, %cst_27 {dimension_numbers = #tpu.dot_dimension_numbers<[1], [0], [0], [1], [0, 0, 1, 1], [], []>} : vector<8x128xf32>, vector<128x128xf32>, vector<8x128xf32> -> vector<8x128xf32>
    %51 = arith.addf %49, %50 : vector<8x128xf32>
    %52 = math.tanh %51 : vector<8x128xf32>
    %c8_i32 = arith.constant 8 : i32
    %c0_28 = arith.constant 0 : index
    %c0_29 = arith.constant 0 : index
    %53 = vector.load %arg6[%c0_28, %c0_29] : memref<8x128xf32, #tpu.memory_space<vmem>>, vector<8x128xf32>
    tpu.vector_store %arg6[%c0_28, %c0_29], %52 {strides = array<i32>} : memref<8x128xf32, #tpu.memory_space<vmem>>, vector<8x128xf32>,
    %c0_i32_30 = arith.constant 0 : i32
    %54 = arith.cmpi eq, %arg0, %c0_i32_30 : i32
    %55 = arith.extui %54 : i1 to i32
    %c0_i32_31 = arith.constant 0 : i32
    %56 = arith.cmpi ne, %55, %c0_i32_31 : i32
    scf.if %56 {
      %c0_32 = arith.constant 0 : index
      %c0_33 = arith.constant 0 : index
      %57 = vector.load %arg6[%c0_32, %c0_33] : memref<8x128xf32, #tpu.memory_space<vmem>>, vector<8x128xf32>
      %c0_34 = arith.constant 0 : index
      %c0_35 = arith.constant 0 : index
      %58 = vector.load %arg3[%c0_34, %c0_35] : memref<128x128xf32, #tpu.memory_space<vmem>>, vector<128x128xf32>
      %cst_36 = arith.constant dense<0.000000e+00> : vector<8x128xf32>
      %59 = tpu.matmul %57, %58, %cst_36 {dimension_numbers = #tpu.dot_dimension_numbers<[1], [0], [0], [1], [0, 0, 1, 1], [], []>} : vector<8x128xf32>, vector<128x128xf32>, vector<8x128xf32> -> vector<8x128xf32>
      %c0_37 = arith.constant 0 : index
      %c0_38 = arith.constant 0 : index
      %60 = vector.load %arg4[%c0_37, %c0_38] : memref<1x128xf32, #tpu.memory_space<vmem>>, vector<1x128xf32>
      %61 = vector.broadcast %60 : vector<1x128xf32> to vector<8x128xf32>
      %62 = arith.addf %59, %61 : vector<8x128xf32>
      %c0_39 = arith.constant 0 : index
      %c0_40 = arith.constant 0 : index
      %63 = vector.load %arg5[%c0_39, %c0_40] : memref<8x128xf32, #tpu.memory_space<vmem>>, vector<8x128xf32>
      tpu.vector_store %arg5[%c0_39, %c0_40], %62 {strides = array<i32>} : memref<8x128xf32, #tpu.memory_space<vmem>>, vector<8x128xf32>,
    } else {
    }
    return
  }
  func.func @transform_0(%arg0: i32) -> (i32, i32, i32) {
    %c0_i32 = arith.constant 0 : i32
    %c0_i32_0 = arith.constant 0 : i32
    %c0_i32_1 = arith.constant 0 : i32
    return %arg0, %c0_i32, %c0_i32_0 : i32, i32, i32
  }
  func.func @transform_1(%arg0: i32) -> (i32, i32) {
    %c0_i32 = arith.constant 0 : i32
    %c0_i32_0 = arith.constant 0 : i32
    %c0_i32_1 = arith.constant 0 : i32
    return %c0_i32, %c0_i32_0 : i32, i32
  }
  func.func @transform_2(%arg0: i32) -> (i32, i32) {
    %c0_i32 = arith.constant 0 : i32
    %c0_i32_0 = arith.constant 0 : i32
    %c0_i32_1 = arith.constant 0 : i32
    return %c0_i32, %c0_i32_0 : i32, i32
  }
  func.func @transform_3(%arg0: i32) -> (i32, i32) {
    %c0_i32 = arith.constant 0 : i32
    %c0_i32_0 = arith.constant 0 : i32
    %c0_i32_1 = arith.constant 0 : i32
    return %c0_i32, %c0_i32_0 : i32, i32
  }
  func.func @transform_4(%arg0: i32) -> (i32, i32) {
    %c0_i32 = arith.constant 0 : i32
    %c0_i32_0 = arith.constant 0 : i32
    %c0_i32_1 = arith.constant 0 : i32
    return %c0_i32, %c0_i32_0 : i32, i32
  }
}

</mosaic_0001>

<bundles_post_ra>
// kernel: tpu_custom_call.1
= control target key start
LH: loop header
LB: loop body
LE: loop exit
PB: predicated region body
PF: predicated region fallthrough
CT: control target
= control target key end

     0   :  { %9 = vsyncpa [#allocation4], 0  ;;  %s1737_s0 = inlined_call_operand.hbm [shape: f32[8,8,128], index: 0, kind: input, shape index: {}]   ;;  %s1738_s1 = inlined_call_operand.hbm [shape: f32[128,128], index: 1, kind: input, shape index: {}]   ;;  %s1739_s2 = inlined_call_operand.hbm [shape: f32[128,128], index: 2, kind: input, shape index: {}]   ;;  %s1740_s3 = inlined_call_operand.vmem [shape: f32[1,128], index: 3, kind: input, shape index: {}]   ;;  %s1741_s4 = inlined_call_operand.hbm [shape: f32[8,128], index: 4, kind: output, shape index: {}]  }
   0x1   :  { %10 = vsyncpa [#allocation7], 0 }
   0x2   :  { %11 = vsyncpa [#allocation5], 0  ;;  %s1366_s15 = smov [#allocation6]   ;;  %s1367_s17 = smov [#allocation3]  }
   0x3   :  { %s29_s16 = sshll.u32 %s1366_s15, 4  ;;  %s17_s18 = sshll.u32 %s1367_s17, 4  ;;  %s30_s16 = int_to_ptr.vmem [resolvable:$true] %s29_s16  ;;  %s18_s18 = int_to_ptr.vmem [resolvable:$true] %s17_s18 }
   0x4   :  { %s1288_s19 = scalar_lea.vmem %s30_s16, 2048  ;;  %p1293_p1 = scmp.lt.s32.totalorder %s30_s16, %s30_s16 }
   0x5   :  { %p1289_p0 = scmp.ne.s32.totalorder %s30_s16, %s1288_s19  ;;  %p1294_p2 = scmp.lt.s32.totalorder %s1288_s19, %s1288_s19 }
   0x7   :  { %p1295_p3 = por %p1294_p2, %p1293_p1 }
   0x9   :  { %p1296_p4 = pnand %p1295_p3, %p1289_p0 }
   0xb   :  { %1299 = shalt.err (!%p1296_p4)
}
   0xc   :  { %s1368_s20 = smov 128   ;;  %s1369_s21 = smov 8  }
   0xd   :  { %35 = dma.hbm_to_vmem [thread:$0]  %s1738_s1, 2048, %s30_s16, [#allocation7], %s1368_s20, %s1368_s20, %s1369_s21  }
   0xe   :  { %s1308_s24 = scalar_lea.vmem %s18_s18, 1024  ;;  %p1313_p6 = scmp.lt.s32.totalorder %s18_s18, %s18_s18 }
   0xf   :  { %p1309_p5 = scmp.ne.s32.totalorder %s18_s18, %s1308_s24  ;;  %p1314_p7 = scmp.lt.s32.totalorder %s1308_s24, %s1308_s24 }
  0x11   :  { %p1315_p8 = por %p1314_p7, %p1313_p6 }
  0x13   :  { %p1316_p9 = pnand %p1315_p8, %p1309_p5 }
  0x15   :  { %1319 = shalt.err (!%p1316_p9)
}
  0x16   :  { %23 = dma.hbm_to_vmem [thread:$0]  %s1737_s0, 1024, %s18_s18, [#allocation4], %s1368_s20, %s1368_s20, %s1369_s21  }
  0x17   :  { %s1370_s27 = smov [#allocation8]  }
  0x18   :  { %s41_s28 = sshll.u32 %s1370_s27, 4  ;;  %s42_s28 = int_to_ptr.vmem [resolvable:$true] %s41_s28 }
  0x19   :  { %s1328_s29 = scalar_lea.vmem %s42_s28, 2048  ;;  %p1333_p11 = scmp.lt.s32.totalorder %s42_s28, %s42_s28 }
  0x1a   :  { %p1329_p10 = scmp.ne.s32.totalorder %s42_s28, %s1328_s29  ;;  %p1334_p12 = scmp.lt.s32.totalorder %s1328_s29, %s1328_s29 }
  0x1c   :  { %p1335_p13 = por %p1334_p12, %p1333_p11 }
  0x1e   :  { %p1336_p0 = pnand %p1335_p13, %p1329_p10 }
  0x20   :  { %1339 = shalt.err (!%p1336_p0)
}
  0x21   :  { %47 = dma.hbm_to_vmem [thread:$0]  %s1739_s2, 2048, %s42_s28, [#allocation7], %s1368_s20, %s1368_s20, %s1369_s21  }
  0x22   :  { %1360 = dma.done.wait [#allocation4], 1024  }
  0x23   :  { %1361 = vsyncadd [#allocation4], 4294966272 }
  0x24   :  { %1362 = dma.done.wait [#allocation7], 4096  }
  0x25   :  { %1363 = vsyncadd [#allocation7], 4294963200  ;;  %v1371_v0 = vmov 0.0   ;;  %vm1372_vm0 = vmmov 0   ;;  %v1414_v1 = vld [vmem:[#allocation6 + $0x78] sm:$0xff]  ;;  %v1416_v2 = vld [vmem:[#allocation6 + $0x70] sm:$0xff] }
  0x26   :  { %941 = vmatprep.subr.mxu0 %v1371_v0  ;;  %973 = vmatprep.mubr.msk.f32.mxu0 %vm1372_vm0, %v1371_v0  ;;  %v1421_v3 = vld [vmem:[#allocation6 + $0x68] sm:$0xff]  ;;  %v1427_v4 = vld [vmem:[#allocation6 + $0x60] sm:$0xff]  ;;  %v1433_v5 = vld [vmem:[#allocation6 + $0x58] sm:$0xff]  ;;  %s1373_s5 = smov [#allocation9]  }
  0x27   :  { %976 = vmatprep.subr.mxu1 %v1371_v0  ;;  %1008 = vmatprep.mubr.msk.f32.mxu1 %vm1372_vm0, %v1371_v0  ;;  %v1439_v6 = vld [vmem:[#allocation6 + $0x50] sm:$0xff]  ;;  %v1445_v7 = vld [vmem:[#allocation6 + $0x48] sm:$0xff]  ;;  %v1451_v8 = vld [vmem:[#allocation6 + $0x40] sm:$0xff]  ;;  %s777_s6 = sshll.u32 %s1373_s5, 4  ;;  %s778_s6 = int_to_ptr.vmem [resolvable:$true] %s777_s6 }
  0x28   :  { %942 = vmatpush3.msra.mxu0 %v1414_v1  ;;  %977 = vmatpush3.msra.mxu1 %v1414_v1  ;;  %v1457_v9 = vld [vmem:[#allocation6 + $0x38] sm:$0xff]  ;;  %v1463_v10 = vld [vmem:[#allocation6 + $0x30] sm:$0xff]  ;;  %v1469_v11 = vld [vmem:[#allocation6 + $0x28] sm:$0xff]  ;;  %s1340_s7 = scalar_lea.vmem %s778_s6, 128  ;;  %p1345_p2 = scmp.lt.s32.totalorder %s778_s6, %s778_s6 }
  0x29   :  { %943 = vmatprep.subr.mxu0 %v1371_v0  ;;  %978 = vmatprep.subr.mxu1 %v1371_v0  ;;  %v1475_v12 = vld [vmem:[#allocation6 + $0x20] sm:$0xff]  ;;  %v1481_v13 = vld [vmem:[#allocation6 + $0x18] sm:$0xff]  ;;  %v1487_v14 = vld [vmem:[#allocation6 + $0x10] sm:$0xff]  ;;  %p1341_p1 = scmp.ne.s32.totalorder %s778_s6, %s1340_s7  ;;  %p1346_p3 = scmp.lt.s32.totalorder %s1340_s7, %s1340_s7 }
  0x2a   :  { %944 = vmatpush3.msra.mxu0 %v1416_v2  ;;  %979 = vmatpush3.msra.mxu1 %v1416_v2  ;;  %v1493_v15 = vld [vmem:[#allocation6 + $0x8] sm:$0xff]  ;;  %v1499_v16 = vld [vmem:[#allocation6] sm:$0xff]  ;;  %v229_v27 = vld [vmem:[#allocation3 + $0x10] sm:$0xff] }
  0x2b   :  { %945 = vmatprep.subr.mxu0 %v1371_v0  ;;  %980 = vmatprep.subr.mxu1 %v1371_v0  ;;  %v81_v17 = vld [vmem:[#allocation3] sm:$0xff]  ;;  %v155_v22 = vld [vmem:[#allocation3 + $0x8] sm:$0xff]  ;;  %v303_v32 = vld [vmem:[#allocation3 + $0x18] sm:$0xff]  ;;  %p1347_p4 = por %p1346_p3, %p1345_p2 }
  0x2c   :  { %946 = vmatpush3.msra.mxu0 %v1421_v3  ;;  %981 = vmatpush3.msra.mxu1 %v1421_v3  ;;  %v377_v37 = vld [vmem:[#allocation3 + $0x20] sm:$0xff]  ;;  %v451_v42 = vld [vmem:[#allocation3 + $0x28] sm:$0xff]  ;;  %v692_v47 = vld [vmem:[#allocation8 + $0x78] sm:$0xff] }
  0x2d   :  { %947 = vmatprep.subr.mxu0 %v1371_v0  ;;  %982 = vmatprep.subr.mxu1 %v1371_v0  ;;  %v691_v48 = vld [vmem:[#allocation8 + $0x70] sm:$0xff]  ;;  %v690_v49 = vld [vmem:[#allocation8 + $0x68] sm:$0xff]  ;;  %v689_v50 = vld [vmem:[#allocation8 + $0x60] sm:$0xff]  ;;  %p1348_p5 = pnand %p1347_p4, %p1341_p1 }
  0x2e   :  { %948 = vmatpush3.msra.mxu0 %v1427_v4  ;;  %983 = vmatpush3.msra.mxu1 %v1427_v4  ;;  %v688_v51 = vld [vmem:[#allocation8 + $0x58] sm:$0xff]  ;;  %v687_v52 = vld [vmem:[#allocation8 + $0x50] sm:$0xff]  ;;  %v686_v53 = vld [vmem:[#allocation8 + $0x48] sm:$0xff] }
  0x2f   :  { %949 = vmatprep.subr.mxu0 %v1371_v0  ;;  %984 = vmatprep.subr.mxu1 %v1371_v0  ;;  %v525_v54 = vld [vmem:[#allocation3 + $0x30] sm:$0xff]  ;;  %v685_v59 = vld [vmem:[#allocation8 + $0x40] sm:$0xff]  ;;  %v684_v60 = vld [vmem:[#allocation8 + $0x38] sm:$0xff] }
  0x30   :  { %950 = vmatpush3.msra.mxu0 %v1433_v5  ;;  %985 = vmatpush3.msra.mxu1 %v1433_v5  ;;  %v683_v61 = vld [vmem:[#allocation8 + $0x30] sm:$0xff]  ;;  %v682_v62 = vld [vmem:[#allocation8 + $0x28] sm:$0xff]  ;;  %v681_v63 = vld [vmem:[#allocation8 + $0x20] sm:$0xff] }
  0x31   :  { %951 = vmatprep.subr.mxu0 %v1371_v0  ;;  %986 = vmatprep.subr.mxu1 %v1371_v0 }
  0x32   :  { %952 = vmatpush3.msra.mxu0 %v1439_v6  ;;  %987 = vmatpush3.msra.mxu1 %v1439_v6 }
  0x33   :  { %953 = vmatprep.subr.mxu0 %v1371_v0  ;;  %988 = vmatprep.subr.mxu1 %v1371_v0 }
  0x34   :  { %954 = vmatpush3.msra.mxu0 %v1445_v7  ;;  %989 = vmatpush3.msra.mxu1 %v1445_v7 }
  0x35   :  { %955 = vmatprep.subr.mxu0 %v1371_v0  ;;  %990 = vmatprep.subr.mxu1 %v1371_v0 }
  0x36   :  { %956 = vmatpush3.msra.mxu0 %v1451_v8  ;;  %991 = vmatpush3.msra.mxu1 %v1451_v8 }
  0x37   :  { %957 = vmatprep.subr.mxu0 %v1371_v0  ;;  %992 = vmatprep.subr.mxu1 %v1371_v0 }
  0x38   :  { %958 = vmatpush3.msra.mxu0 %v1457_v9  ;;  %993 = vmatpush3.msra.mxu1 %v1457_v9 }
  0x39   :  { %959 = vmatprep.subr.mxu0 %v1371_v0  ;;  %994 = vmatprep.subr.mxu1 %v1371_v0 }
  0x3a   :  { %960 = vmatpush3.msra.mxu0 %v1463_v10  ;;  %995 = vmatpush3.msra.mxu1 %v1463_v10 }
  0x3b   :  { %961 = vmatprep.subr.mxu0 %v1371_v0  ;;  %996 = vmatprep.subr.mxu1 %v1371_v0 }
  0x3c   :  { %962 = vmatpush3.msra.mxu0 %v1469_v11  ;;  %997 = vmatpush3.msra.mxu1 %v1469_v11 }
  0x3d   :  { %963 = vmatprep.subr.mxu0 %v1371_v0  ;;  %998 = vmatprep.subr.mxu1 %v1371_v0 }
  0x3e   :  { %964 = vmatpush3.msra.mxu0 %v1475_v12  ;;  %999 = vmatpush3.msra.mxu1 %v1475_v12 }
  0x3f   :  { %965 = vmatprep.subr.mxu0 %v1371_v0  ;;  %1000 = vmatprep.subr.mxu1 %v1371_v0 }
  0x40   :  { %966 = vmatpush3.msra.mxu0 %v1481_v13  ;;  %1001 = vmatpush3.msra.mxu1 %v1481_v13 }
  0x41   :  { %967 = vmatprep.subr.mxu0 %v1371_v0  ;;  %1002 = vmatprep.subr.mxu1 %v1371_v0 }
  0x42   :  { %968 = vmatpush3.msra.mxu0 %v1487_v14  ;;  %1003 = vmatpush3.msra.mxu1 %v1487_v14 }
  0x43   :  { %969 = vmatprep.subr.mxu0 %v1371_v0  ;;  %1004 = vmatprep.subr.mxu1 %v1371_v0 }
  0x44   :  { %970 = vmatpush3.msra.mxu0 %v1493_v15  ;;  %1005 = vmatpush3.msra.mxu1 %v1493_v15 }
  0x45   :  { %971 = vmatprep.subr.mxu0 %v1371_v0  ;;  %1006 = vmatprep.subr.mxu1 %v1371_v0 }
  0x46   :  { %972 = vmatpush3.msra.mxu0 %v1499_v16  ;;  %1007 = vmatpush3.msra.mxu1 %v1499_v16 }
  0x47   :  { %974 = vmatmul.mubr.f32.vlgmr.msra.gmra.mxu0 %v1371_v0  ;;  %1011 = vmatprep.subr.mxu0 %v1371_v0 }
  0x48   :  { %1012 = vmatpush3.msra.mxu0 %v1414_v1  ;;  %1043 = vmatprep.mubr.msk.f32.mxu0 %vm1372_vm0, %v1371_v0 }
  0x49   :  { %1013 = vmatprep.subr.mxu0 %v1371_v0  ;;  %1046 = vmatprep.subr.mxu1 %v1371_v0 }
  0x4a   :  { %1014 = vmatpush3.msra.mxu0 %v1416_v2 }
  0x4b   :  { %1015 = vmatprep.subr.mxu0 %v1371_v0 }
  0x4c   :  { %1016 = vmatpush3.msra.mxu0 %v1421_v3 }
  0x4d   :  { %1017 = vmatprep.subr.mxu0 %v1371_v0 }
  0x4e   :  { %1018 = vmatpush3.msra.mxu0 %v1427_v4 }
  0x4f   :  { %1019 = vmatprep.subr.mxu0 %v1371_v0 }
  0x50   :  { %1020 = vmatpush3.msra.mxu0 %v1433_v5 }
  0x51   :  { %1021 = vmatprep.subr.mxu0 %v1371_v0 }
  0x52   :  { %1022 = vmatpush3.msra.mxu0 %v1439_v6 }
  0x53   :  { %1023 = vmatprep.subr.mxu0 %v1371_v0 }
  0x54   :  { %1024 = vmatpush3.msra.mxu0 %v1445_v7 }
  0x55   :  { %1025 = vmatprep.subr.mxu0 %v1371_v0 }
  0x56   :  { %1026 = vmatpush3.msra.mxu0 %v1451_v8 }
  0x57   :  { %1027 = vmatprep.subr.mxu0 %v1371_v0 }
  0x58   :  { %1028 = vmatpush3.msra.mxu0 %v1457_v9 }
  0x59   :  { %1029 = vmatprep.subr.mxu0 %v1371_v0 }
  0x5a   :  { %1030 = vmatpush3.msra.mxu0 %v1463_v10 }
  0x5b   :  { %1031 = vmatprep.subr.mxu0 %v1371_v0 }
  0x5c   :  { %1032 = vmatpush3.msra.mxu0 %v1469_v11 }
  0x5d   :  { %1033 = vmatprep.subr.mxu0 %v1371_v0 }
  0x5e   :  { %1034 = vmatpush3.msra.mxu0 %v1475_v12 }
  0x5f   :  { %1035 = vmatprep.subr.mxu0 %v1371_v0 }
  0x60   :  { %1036 = vmatpush3.msra.mxu0 %v1481_v13 }
  0x61   :  { %1037 = vmatprep.subr.mxu0 %v1371_v0 }
  0x62   :  { %1038 = vmatpush3.msra.mxu0 %v1487_v14 }
  0x63   :  { %1039 = vmatprep.subr.mxu0 %v1371_v0 }
  0x64   :  { %1040 = vmatpush3.msra.mxu0 %v1493_v15 }
  0x65   :  { %1041 = vmatprep.subr.mxu0 %v1371_v0 }
  0x66   :  { %1042 = vmatpush3.msra.mxu0 %v1499_v16 }
  0x67   :  { %1081 = vmatprep.subr.mxu0 %v1371_v0 }
 0x107   :  { %v148_v18 = vpop.f32.mrf.mxu0 }
 0x108   :  { %v152_v19 = vadd.f32 %v148_v18, %v81_v17 }
 0x109   :  { %v975_v20 = vpop.f32.mrf.mxu0 }
 0x10a   :  { %1264 = vtanh.f32 %v152_v19 }
 0x117   :  { %v1265_v21 = vpop.eup %1264 }
 0x118   :  { %1009 = vmatmul.mubr.f32.vlgmr.msra.gmra.mxu1 %v1265_v21 }
 0x119   :  { %1047 = vmatpush3.msra.mxu1 %v1414_v1  ;;  %1078 = vmatprep.mubr.msk.f32.mxu1 %vm1372_vm0, %v1371_v0 }
 0x11a   :  { %1048 = vmatprep.subr.mxu1 %v1371_v0 }
 0x11b   :  { %1049 = vmatpush3.msra.mxu1 %v1416_v2 }
 0x11c   :  { %1050 = vmatprep.subr.mxu1 %v1371_v0 }
 0x11d   :  { %1051 = vmatpush3.msra.mxu1 %v1421_v3 }
 0x11e   :  { %1052 = vmatprep.subr.mxu1 %v1371_v0 }
 0x11f   :  { %1053 = vmatpush3.msra.mxu1 %v1427_v4 }
 0x120   :  { %1054 = vmatprep.subr.mxu1 %v1371_v0 }
 0x121   :  { %1055 = vmatpush3.msra.mxu1 %v1433_v5 }
 0x122   :  { %1056 = vmatprep.subr.mxu1 %v1371_v0 }
 0x123   :  { %1057 = vmatpush3.msra.mxu1 %v1439_v6 }
 0x124   :  { %1058 = vmatprep.subr.mxu1 %v1371_v0 }
 0x125   :  { %1059 = vmatpush3.msra.mxu1 %v1445_v7 }
 0x126   :  { %1060 = vmatprep.subr.mxu1 %v1371_v0 }
 0x127   :  { %1061 = vmatpush3.msra.mxu1 %v1451_v8 }
 0x128   :  { %1062 = vmatprep.subr.mxu1 %v1371_v0 }
 0x129   :  { %1063 = vmatpush3.msra.mxu1 %v1457_v9 }
 0x12a   :  { %1064 = vmatprep.subr.mxu1 %v1371_v0 }
 0x12b   :  { %1065 = vmatpush3.msra.mxu1 %v1463_v10 }
 0x12c   :  { %1066 = vmatprep.subr.mxu1 %v1371_v0 }
 0x12d   :  { %1067 = vmatpush3.msra.mxu1 %v1469_v11 }
 0x12e   :  { %1068 = vmatprep.subr.mxu1 %v1371_v0 }
 0x12f   :  { %1069 = vmatpush3.msra.mxu1 %v1475_v12 }
 0x130   :  { %1070 = vmatprep.subr.mxu1 %v1371_v0 }
 0x131   :  { %1071 = vmatpush3.msra.mxu1 %v1481_v13 }
 0x132   :  { %1072 = vmatprep.subr.mxu1 %v1371_v0 }
 0x133   :  { %1073 = vmatpush3.msra.mxu1 %v1487_v14 }
 0x134   :  { %1074 = vmatprep.subr.mxu1 %v1371_v0 }
 0x135   :  { %1075 = vmatpush3.msra.mxu1 %v1493_v15 }
 0x136   :  { %1076 = vmatprep.subr.mxu1 %v1371_v0 }
 0x137   :  { %1077 = vmatpush3.msra.mxu1 %v1499_v16 }
 0x138   :  { %1116 = vmatprep.subr.mxu1 %v1371_v0 }
 0x1d8   :  { %v222_v23 = vpop.f32.mrf.mxu1 }
 0x1d9   :  { %v226_v24 = vadd.f32 %v222_v23, %v155_v22 }
 0x1da   :  { %v1010_v25 = vpop.f32.mrf.mxu1 }
 0x1db   :  { %1266 = vtanh.f32 %v226_v24 }
 0x1e8   :  { %v1267_v26 = vpop.eup %1266 }
 0x1e9   :  { %1044 = vmatmul.mubr.f32.vlgmr.msra.gmra.mxu0 %v1267_v26 }
 0x1ea   :  { %1082 = vmatpush3.msra.mxu0 %v1414_v1  ;;  %1113 = vmatprep.mubr.msk.f32.mxu0 %vm1372_vm0, %v1371_v0 }
 0x1eb   :  { %1083 = vmatprep.subr.mxu0 %v1371_v0 }
 0x1ec   :  { %1084 = vmatpush3.msra.mxu0 %v1416_v2 }
 0x1ed   :  { %1085 = vmatprep.subr.mxu0 %v1371_v0 }
 0x1ee   :  { %1086 = vmatpush3.msra.mxu0 %v1421_v3 }
 0x1ef   :  { %1087 = vmatprep.subr.mxu0 %v1371_v0 }
 0x1f0   :  { %1088 = vmatpush3.msra.mxu0 %v1427_v4 }
 0x1f1   :  { %1089 = vmatprep.subr.mxu0 %v1371_v0 }
 0x1f2   :  { %1090 = vmatpush3.msra.mxu0 %v1433_v5 }
 0x1f3   :  { %1091 = vmatprep.subr.mxu0 %v1371_v0 }
 0x1f4   :  { %1092 = vmatpush3.msra.mxu0 %v1439_v6 }
 0x1f5   :  { %1093 = vmatprep.subr.mxu0 %v1371_v0 }
 0x1f6   :  { %1094 = vmatpush3.msra.mxu0 %v1445_v7 }
 0x1f7   :  { %1095 = vmatprep.subr.mxu0 %v1371_v0 }
 0x1f8   :  { %1096 = vmatpush3.msra.mxu0 %v1451_v8 }
 0x1f9   :  { %1097 = vmatprep.subr.mxu0 %v1371_v0 }
 0x1fa   :  { %1098 = vmatpush3.msra.mxu0 %v1457_v9 }
 0x1fb   :  { %1099 = vmatprep.subr.mxu0 %v1371_v0 }
 0x1fc   :  { %1100 = vmatpush3.msra.mxu0 %v1463_v10 }
 0x1fd   :  { %1101 = vmatprep.subr.mxu0 %v1371_v0 }
 0x1fe   :  { %1102 = vmatpush3.msra.mxu0 %v1469_v11 }
 0x1ff   :  { %1103 = vmatprep.subr.mxu0 %v1371_v0 }
 0x200   :  { %1104 = vmatpush3.msra.mxu0 %v1475_v12 }
 0x201   :  { %1105 = vmatprep.subr.mxu0 %v1371_v0 }
 0x202   :  { %1106 = vmatpush3.msra.mxu0 %v1481_v13 }
 0x203   :  { %1107 = vmatprep.subr.mxu0 %v1371_v0 }
 0x204   :  { %1108 = vmatpush3.msra.mxu0 %v1487_v14 }
 0x205   :  { %1109 = vmatprep.subr.mxu0 %v1371_v0 }
 0x206   :  { %1110 = vmatpush3.msra.mxu0 %v1493_v15 }
 0x207   :  { %1111 = vmatprep.subr.mxu0 %v1371_v0 }
 0x208   :  { %1112 = vmatpush3.msra.mxu0 %v1499_v16 }
 0x209   :  { %1151 = vmatprep.subr.mxu0 %v1371_v0 }
 0x2a9   :  { %v296_v28 = vpop.f32.mrf.mxu0 }
 0x2aa   :  { %v300_v29 = vadd.f32 %v296_v28, %v229_v27 }
 0x2ab   :  { %v1045_v30 = vpop.f32.mrf.mxu0 }
 0x2ac   :  { %1268 = vtanh.f32 %v300_v29 }
 0x2b9   :  { %v1269_v31 = vpop.eup %1268 }
 0x2ba   :  { %1079 = vmatmul.mubr.f32.vlgmr.msra.gmra.mxu1 %v1269_v31 }
 0x2bb   :  { %1117 = vmatpush3.msra.mxu1 %v1414_v1  ;;  %1148 = vmatprep.mubr.msk.f32.mxu1 %vm1372_vm0, %v1371_v0 }
 0x2bc   :  { %1118 = vmatprep.subr.mxu1 %v1371_v0 }
 0x2bd   :  { %1119 = vmatpush3.msra.mxu1 %v1416_v2 }
 0x2be   :  { %1120 = vmatprep.subr.mxu1 %v1371_v0 }
 0x2bf   :  { %1121 = vmatpush3.msra.mxu1 %v1421_v3 }
 0x2c0   :  { %1122 = vmatprep.subr.mxu1 %v1371_v0 }
 0x2c1   :  { %1123 = vmatpush3.msra.mxu1 %v1427_v4 }
 0x2c2   :  { %1124 = vmatprep.subr.mxu1 %v1371_v0 }
 0x2c3   :  { %1125 = vmatpush3.msra.mxu1 %v1433_v5 }
 0x2c4   :  { %1126 = vmatprep.subr.mxu1 %v1371_v0 }
 0x2c5   :  { %1127 = vmatpush3.msra.mxu1 %v1439_v6 }
 0x2c6   :  { %1128 = vmatprep.subr.mxu1 %v1371_v0 }
 0x2c7   :  { %1129 = vmatpush3.msra.mxu1 %v1445_v7 }
 0x2c8   :  { %1130 = vmatprep.subr.mxu1 %v1371_v0 }
 0x2c9   :  { %1131 = vmatpush3.msra.mxu1 %v1451_v8 }
 0x2ca   :  { %1132 = vmatprep.subr.mxu1 %v1371_v0 }
 0x2cb   :  { %1133 = vmatpush3.msra.mxu1 %v1457_v9 }
 0x2cc   :  { %1134 = vmatprep.subr.mxu1 %v1371_v0 }
 0x2cd   :  { %1135 = vmatpush3.msra.mxu1 %v1463_v10 }
 0x2ce   :  { %1136 = vmatprep.subr.mxu1 %v1371_v0 }
 0x2cf   :  { %1137 = vmatpush3.msra.mxu1 %v1469_v11 }
 0x2d0   :  { %1138 = vmatprep.subr.mxu1 %v1371_v0 }
 0x2d1   :  { %1139 = vmatpush3.msra.mxu1 %v1475_v12 }
 0x2d2   :  { %1140 = vmatprep.subr.mxu1 %v1371_v0 }
 0x2d3   :  { %1141 = vmatpush3.msra.mxu1 %v1481_v13 }
 0x2d4   :  { %1142 = vmatprep.subr.mxu1 %v1371_v0 }
 0x2d5   :  { %1143 = vmatpush3.msra.mxu1 %v1487_v14 }
 0x2d6   :  { %1144 = vmatprep.subr.mxu1 %v1371_v0 }
 0x2d7   :  { %1145 = vmatpush3.msra.mxu1 %v1493_v15 }
 0x2d8   :  { %1146 = vmatprep.subr.mxu1 %v1371_v0 }
 0x2d9   :  { %1147 = vmatpush3.msra.mxu1 %v1499_v16 }
 0x2da   :  { %1186 = vmatprep.subr.mxu1 %v1371_v0 }
 0x37a   :  { %v370_v33 = vpop.f32.mrf.mxu1 }
 0x37b   :  { %v374_v34 = vadd.f32 %v370_v33, %v303_v32 }
 0x37c   :  { %v1080_v35 = vpop.f32.mrf.mxu1 }
 0x37d   :  { %1270 = vtanh.f32 %v374_v34 }
 0x38a   :  { %v1271_v36 = vpop.eup %1270 }
 0x38b   :  { %1114 = vmatmul.mubr.f32.vlgmr.msra.gmra.mxu0 %v1271_v36 }
 0x38c   :  { %1152 = vmatpush3.msra.mxu0 %v1414_v1  ;;  %1183 = vmatprep.mubr.msk.f32.mxu0 %vm1372_vm0, %v1371_v0 }
 0x38d   :  { %1153 = vmatprep.subr.mxu0 %v1371_v0 }
 0x38e   :  { %1154 = vmatpush3.msra.mxu0 %v1416_v2 }
 0x38f   :  { %1155 = vmatprep.subr.mxu0 %v1371_v0 }
 0x390   :  { %1156 = vmatpush3.msra.mxu0 %v1421_v3 }
 0x391   :  { %1157 = vmatprep.subr.mxu0 %v1371_v0 }
 0x392   :  { %1158 = vmatpush3.msra.mxu0 %v1427_v4 }
 0x393   :  { %1159 = vmatprep.subr.mxu0 %v1371_v0 }
 0x394   :  { %1160 = vmatpush3.msra.mxu0 %v1433_v5 }
 0x395   :  { %1161 = vmatprep.subr.mxu0 %v1371_v0 }
 0x396   :  { %1162 = vmatpush3.msra.mxu0 %v1439_v6 }
 0x397   :  { %1163 = vmatprep.subr.mxu0 %v1371_v0 }
 0x398   :  { %1164 = vmatpush3.msra.mxu0 %v1445_v7 }
 0x399   :  { %1165 = vmatprep.subr.mxu0 %v1371_v0 }
 0x39a   :  { %1166 = vmatpush3.msra.mxu0 %v1451_v8 }
 0x39b   :  { %1167 = vmatprep.subr.mxu0 %v1371_v0 }
 0x39c   :  { %1168 = vmatpush3.msra.mxu0 %v1457_v9 }
 0x39d   :  { %1169 = vmatprep.subr.mxu0 %v1371_v0 }
 0x39e   :  { %1170 = vmatpush3.msra.mxu0 %v1463_v10 }
 0x39f   :  { %1171 = vmatprep.subr.mxu0 %v1371_v0 }
 0x3a0   :  { %1172 = vmatpush3.msra.mxu0 %v1469_v11 }
 0x3a1   :  { %1173 = vmatprep.subr.mxu0 %v1371_v0 }
 0x3a2   :  { %1174 = vmatpush3.msra.mxu0 %v1475_v12 }
 0x3a3   :  { %1175 = vmatprep.subr.mxu0 %v1371_v0 }
 0x3a4   :  { %1176 = vmatpush3.msra.mxu0 %v1481_v13 }
 0x3a5   :  { %1177 = vmatprep.subr.mxu0 %v1371_v0 }
 0x3a6   :  { %1178 = vmatpush3.msra.mxu0 %v1487_v14 }
 0x3a7   :  { %1179 = vmatprep.subr.mxu0 %v1371_v0 }
 0x3a8   :  { %1180 = vmatpush3.msra.mxu0 %v1493_v15 }
 0x3a9   :  { %1181 = vmatprep.subr.mxu0 %v1371_v0 }
 0x3aa   :  { %1182 = vmatpush3.msra.mxu0 %v1499_v16 }
 0x3ab   :  { %1221 = vmatprep.subr.mxu0 %v1371_v0 }
 0x44b   :  { %v444_v38 = vpop.f32.mrf.mxu0 }
 0x44c   :  { %v448_v39 = vadd.f32 %v444_v38, %v377_v37 }
 0x44d   :  { %v1115_v40 = vpop.f32.mrf.mxu0 }
 0x44e   :  { %1272 = vtanh.f32 %v448_v39 }
 0x45b   :  { %v1273_v41 = vpop.eup %1272 }
 0x45c   :  { %1149 = vmatmul.mubr.f32.vlgmr.msra.gmra.mxu1 %v1273_v41 }
 0x45d   :  { %1187 = vmatpush3.msra.mxu1 %v1414_v1  ;;  %1218 = vmatprep.mubr.msk.f32.mxu1 %vm1372_vm0, %v1371_v0  ;;  %v680_v1 = vld [vmem:[#allocation8 + $0x18] sm:$0xff] }
 0x45e   :  { %1188 = vmatprep.subr.mxu1 %v1371_v0 }
 0x45f   :  { %1189 = vmatpush3.msra.mxu1 %v1416_v2  ;;  %v679_v2 = vld [vmem:[#allocation8 + $0x10] sm:$0xff] }
 0x460   :  { %1190 = vmatprep.subr.mxu1 %v1371_v0 }
 0x461   :  { %1191 = vmatpush3.msra.mxu1 %v1421_v3  ;;  %v678_v3 = vld [vmem:[#allocation8 + $0x8] sm:$0xff] }
 0x462   :  { %1192 = vmatprep.subr.mxu1 %v1371_v0 }
 0x463   :  { %1193 = vmatpush3.msra.mxu1 %v1427_v4  ;;  %v677_v4 = vld [vmem:[#allocation8] sm:$0xff] }
 0x464   :  { %1194 = vmatprep.subr.mxu1 %v1371_v0 }
 0x465   :  { %1195 = vmatpush3.msra.mxu1 %v1433_v5  ;;  %v599_v5 = vld [vmem:[#allocation3 + $0x38] sm:$0xff] }
 0x466   :  { %1196 = vmatprep.subr.mxu1 %v1371_v0 }
 0x467   :  { %1197 = vmatpush3.msra.mxu1 %v1439_v6 }
 0x468   :  { %1198 = vmatprep.subr.mxu1 %v1371_v0 }
 0x469   :  { %1199 = vmatpush3.msra.mxu1 %v1445_v7 }
 0x46a   :  { %1200 = vmatprep.subr.mxu1 %v1371_v0 }
 0x46b   :  { %1201 = vmatpush3.msra.mxu1 %v1451_v8 }
 0x46c   :  { %1202 = vmatprep.subr.mxu1 %v1371_v0 }
 0x46d   :  { %1203 = vmatpush3.msra.mxu1 %v1457_v9 }
 0x46e   :  { %1204 = vmatprep.subr.mxu1 %v1371_v0 }
 0x46f   :  { %1205 = vmatpush3.msra.mxu1 %v1463_v10  ;;  %v787_v10 = vld [vmem:[%s1740_s3] ss:$0 sm:$0xff] }
 0x470   :  { %1206 = vmatprep.subr.mxu1 %v1371_v0 }
 0x471   :  { %1207 = vmatpush3.msra.mxu1 %v1469_v11 }
 0x472   :  { %1208 = vmatprep.subr.mxu1 %v1371_v0 }
 0x473   :  { %1209 = vmatpush3.msra.mxu1 %v1475_v12 }
 0x474   :  { %1210 = vmatprep.subr.mxu1 %v1371_v0 }
 0x475   :  { %1211 = vmatpush3.msra.mxu1 %v1481_v13 }
 0x476   :  { %1212 = vmatprep.subr.mxu1 %v1371_v0 }
 0x477   :  { %1213 = vmatpush3.msra.mxu1 %v1487_v14 }
 0x478   :  { %1214 = vmatprep.subr.mxu1 %v1371_v0 }
 0x479   :  { %1215 = vmatpush3.msra.mxu1 %v1493_v15 }
 0x47a   :  { %1216 = vmatprep.subr.mxu1 %v1371_v0 }
 0x47b   :  { %1217 = vmatpush3.msra.mxu1 %v1499_v16 }
 0x51c   :  { %v518_v43 = vpop.f32.mrf.mxu1 }
 0x51d   :  { %v522_v44 = vadd.f32 %v518_v43, %v451_v42 }
 0x51e   :  { %v1150_v45 = vpop.f32.mrf.mxu1 }
 0x51f   :  { %1274 = vtanh.f32 %v522_v44 }
 0x52c   :  { %v1275_v46 = vpop.eup %1274 }
 0x52d   :  { %1184 = vmatmul.mubr.f32.vlgmr.msra.gmra.mxu0 %v1275_v46 }
 0x52e   :  { %1253 = vmatprep.mubr.msk.f32.mxu0 %vm1372_vm0, %v1371_v0  ;;  %1222 = vmatpush3.msra.mxu0 %v692_v47 }
 0x52f   :  { %1223 = vmatprep.subr.mxu0 %v1371_v0 }
 0x530   :  { %1224 = vmatpush3.msra.mxu0 %v691_v48 }
 0x531   :  { %1225 = vmatprep.subr.mxu0 %v1371_v0 }
 0x532   :  { %1226 = vmatpush3.msra.mxu0 %v690_v49 }
 0x533   :  { %1227 = vmatprep.subr.mxu0 %v1371_v0 }
 0x534   :  { %1228 = vmatpush3.msra.mxu0 %v689_v50 }
 0x535   :  { %1229 = vmatprep.subr.mxu0 %v1371_v0 }
 0x536   :  { %1230 = vmatpush3.msra.mxu0 %v688_v51 }
 0x537   :  { %1231 = vmatprep.subr.mxu0 %v1371_v0 }
 0x538   :  { %1232 = vmatpush3.msra.mxu0 %v687_v52 }
 0x539   :  { %1233 = vmatprep.subr.mxu0 %v1371_v0 }
 0x53a   :  { %1234 = vmatpush3.msra.mxu0 %v686_v53 }
 0x53b   :  { %1235 = vmatprep.subr.mxu0 %v1371_v0 }
 0x53c   :  { %1236 = vmatpush3.msra.mxu0 %v685_v59 }
 0x53d   :  { %1237 = vmatprep.subr.mxu0 %v1371_v0 }
 0x53e   :  { %1238 = vmatpush3.msra.mxu0 %v684_v60 }
 0x53f   :  { %1239 = vmatprep.subr.mxu0 %v1371_v0 }
 0x540   :  { %1240 = vmatpush3.msra.mxu0 %v683_v61 }
 0x541   :  { %1241 = vmatprep.subr.mxu0 %v1371_v0 }
 0x542   :  { %1242 = vmatpush3.msra.mxu0 %v682_v62 }
 0x543   :  { %1243 = vmatprep.subr.mxu0 %v1371_v0 }
 0x544   :  { %1244 = vmatpush3.msra.mxu0 %v681_v63 }
 0x545   :  { %1245 = vmatprep.subr.mxu0 %v1371_v0 }
 0x546   :  { %1246 = vmatpush3.msra.mxu0 %v680_v1 }
 0x547   :  { %1247 = vmatprep.subr.mxu0 %v1371_v0 }
 0x548   :  { %1248 = vmatpush3.msra.mxu0 %v679_v2 }
 0x549   :  { %1249 = vmatprep.subr.mxu0 %v1371_v0 }
 0x54a   :  { %1250 = vmatpush3.msra.mxu0 %v678_v3 }
 0x54b   :  { %1251 = vmatprep.subr.mxu0 %v1371_v0 }
 0x54c   :  { %1252 = vmatpush3.msra.mxu0 %v677_v4 }
 0x5ed   :  { %v592_v55 = vpop.f32.mrf.mxu0 }
 0x5ee   :  { %v596_v56 = vadd.f32 %v592_v55, %v525_v54 }
 0x5ef   :  { %v1185_v57 = vpop.f32.mrf.mxu0 }
 0x5f0   :  { %1276 = vtanh.f32 %v596_v56 }
 0x5fd   :  { %v1277_v58 = vpop.eup %1276 }
 0x5fe   :  { %1219 = vmatmul.mubr.f32.vlgmr.msra.gmra.mxu1 %v1277_v58 }
 0x6be   :  { %v666_v6 = vpop.f32.mrf.mxu1 }
 0x6bf   :  { %v670_v7 = vadd.f32 %v666_v6, %v599_v5 }
 0x6c0   :  { %v1220_v8 = vpop.f32.mrf.mxu1 }
 0x6c1   :  { %1278 = vtanh.f32 %v670_v7 }
 0x6ce   :  { %v1279_v9 = vpop.eup %1278 }
 0x6cf   :  { %1254 = vmatmul.mubr.f32.vlgmr.msra.gmra.mxu0 %v1279_v9 }
 0x78f   :  { %v766_v11 = vpop.f32.mrf.mxu0 }
 0x790   :  { %v767_v12 = vadd.f32 %v787_v10, %v766_v11 }
 0x791   :  { %v1255_v13 = vpop.f32.mrf.mxu0 }
 0x792   :  { %770 = vst [vmem:[#allocation9] sm:$0xff] %v767_v12 }
 0x793   :  { %1351 = shalt.err (!%p1348_p5)
}
 0x794   :  { %780 = dma.vmem_to_hbm [thread:$0]  %s778_s6, 128, %s1741_s4, [#allocation5]  }
 0x795   :  { %1364 = dma.done.wait [#allocation5], 128  }
 0x796   :  { %1365 = vsyncadd [#allocation5], 4294967168 }
 0x797   :  { %784 = vsyncpa [#allocation4], 1 }
 0x798   :  { %785 = vsyncpa [#allocation7], 1 }
 0x799   :  { %786 = vsyncpa [#allocation5], 1 }

</bundles_post_ra>
